<compile_context>
chip_gen: v6e
topology: v6e:2x2x1
jax: 0.10.0
libtpu: 0.0.40
codegen_flags: <defaults>
</compile_context>

<pallas_src>
import functools

import jax
import jax.numpy as jnp
import numpy as np
from jax.experimental import pallas as pl
from jax.experimental.pallas import tpu as pltpu

EPS = 1e-5
HIDDEN = 64
OUT_CH = 4
K1 = 4          # first conv kernel size
STRIDE1 = 2     # first conv stride
K1P = 8         # first-conv contraction padded to 8: 4 taps + 1 bias column + 3 zeros


def subconv_kernel(patches_ref, w1_ref, gamma_ref, beta_ref,
                   wf_ref, wb_ref, bb_ref, out_ref, *, Lo):
    # patches_ref: (M, K1P)       im2col of the first conv + ones column (bias fold)
    # w1_ref:      (K1P, C)       first conv weight rows + bias row + zero rows
    # gamma_ref/beta_ref: (4, C)  BN affine params (2 per residual block)
    # wf_ref:      (4, 3*C, C)    residual conv3 weights, taps fused along K (bf16)
    # wb_ref:      (C, OUT_CH)    1x1 output conv,   bb_ref: (1, OUT_CH)
    # out_ref:     (M, OUT_CH)    length-major output; channel reorder done in wrapper
    M = patches_ref.shape[0]
    C = w1_ref.shape[1]
    B = M // Lo

    # --- hoisted halo masks: built once, reused by all 4 conv3 calls ---
    l_idx = jax.lax.broadcasted_iota(jnp.int32, (B, Lo, C), 1).reshape(M, C)
    mask_first = l_idx == 0
    mask_last = l_idx == Lo - 1

    def bn_relu(x, g, b):
        # training-mode BN; one-pass stats: the two reductions are independent,
        # normalize is a single FMA.  rsqrt goes to the EUP slot.
        mu = jnp.mean(x, axis=0, keepdims=True)
        ms = jnp.mean(x * x, axis=0, keepdims=True)
        scale = jax.lax.rsqrt(ms - mu * mu + EPS) * g
        shift = b - mu * scale
        return jnp.maximum(x * scale + shift, 0.0)

    def conv3(y, wf):
        # kernel=3, stride=1, pad=1 as ONE (M, 3C) @ (3C, C) bf16 MXU matmul.
        # roll along the sublane (length) axis; edge/batch-boundary rows masked to 0,
        # which is exactly the zero padding of the PyTorch conv.  Masks/rolls stay
        # f32 (v5e-safe); taps are cast to bf16 before the concat (half-width concat).
        y_prev = jnp.where(mask_first, 0.0, pltpu.roll(y, shift=1, axis=0))
        y_next = jnp.where(mask_last, 0.0, pltpu.roll(y, shift=M - 1, axis=0))
        x_stack = jnp.concatenate([y_prev.astype(jnp.bfloat16),
                                   y.astype(jnp.bfloat16),
                                   y_next.astype(jnp.bfloat16)], axis=-1)   # (M, 3C) bf16
        return jnp.dot(x_stack, wf, preferred_element_type=jnp.float32)     # (M, C) f32

    # --- first conv: Conv1d(1, C, kernel=4, stride=2) as one small MXU dot ---
    # bias is folded via the ones column in patches / bias row in w1.
    h = jnp.dot(patches_ref[...], w1_ref[...], preferred_element_type=jnp.float32)

    # --- two residual blocks: BN -> ReLU -> Conv3 -> BN -> ReLU -> Conv3 -> +x ---
    for i in range(2):
        y = bn_relu(h, gamma_ref[2 * i], beta_ref[2 * i])
        t = conv3(y, wf_ref[2 * i])
        y2 = bn_relu(t, gamma_ref[2 * i + 1], beta_ref[2 * i + 1])
        h = h + conv3(y2, wf_ref[2 * i + 1])

    # --- 1x1 output conv (tiny, f32); single lane-dense-ish store of (M, OUT_CH) ---
    out_ref[...] = jnp.dot(h, wb_ref[...],
                           preferred_element_type=jnp.float32) + bb_ref[...]


@jax.jit
def subconvnet_forward(x, params):
    """x: (B, 1, L_in) float32 (PyTorch NCL).  Returns (B, OUT_CH * Lo)."""
    B, cin, Lin = x.shape
    assert cin == 1
    C = HIDDEN
    Lo = (Lin - K1) // STRIDE1 + 1
    M = B * Lo

    # im2col for the first conv (in_channel = 1): patches[b*Lo+l, k] = x[b, 0, 2l + k]
    patches = jnp.stack(
        [x[:, 0, k:k + STRIDE1 * Lo:STRIDE1] for k in range(K1)], axis=-1
    ).reshape(M, K1).astype(jnp.float32)
    # pad to K1P columns: column K1 is all-ones (folds the conv1 bias), rest zero
    patches8 = jnp.concatenate(
        [patches,
         jnp.ones((M, 1), jnp.float32),
         jnp.zeros((M, K1P - K1 - 1), jnp.float32)], axis=-1)                # (M, 8)

    # Re-layout weights for the (length, channel) kernel layout.
    w1m = jnp.transpose(params["w1"][:, 0, :])                               # (K1, C)
    w18 = jnp.concatenate(
        [w1m,
         params["b1"].reshape(1, C),
         jnp.zeros((K1P - K1 - 1, C), jnp.float32)], axis=0)                 # (8, C)

    gammas = params["gamma"]                                                 # (4, C)
    betas = params["beta"]                                                   # (4, C)
    # fuse the 3 taps along K: row block k holds the (C_in, C_out) matrix of tap k
    wfused = jnp.stack(
        [jnp.transpose(w, (2, 1, 0)).reshape(3 * C, C) for w in params["wc"]]
    ).astype(jnp.bfloat16)                                                   # (4, 3C, C)
    wbm = jnp.transpose(params["wb"][:, :, 0])                               # (C, OUT_CH)
    bbr = params["bb"].reshape(1, OUT_CH)

    out = pl.pallas_call(
        functools.partial(subconv_kernel, Lo=Lo),
        out_shape=jax.ShapeDtypeStruct((M, OUT_CH), jnp.float32),
        grid=(1,),
        in_specs=[
            pl.BlockSpec((M, K1P), lambda i: (0, 0)),
            pl.BlockSpec((K1P, C), lambda i: (0, 0)),
            pl.BlockSpec((4, C), lambda i: (0, 0)),
            pl.BlockSpec((4, C), lambda i: (0, 0)),
            pl.BlockSpec((4, 3 * C, C), lambda i: (0, 0, 0)),
            pl.BlockSpec((C, OUT_CH), lambda i: (0, 0)),
            pl.BlockSpec((1, OUT_CH), lambda i: (0, 0)),
        ],
        out_specs=pl.BlockSpec((M, OUT_CH), lambda i: (0, 0)),
        compiler_params=pltpu.CompilerParams(dimension_semantics=("arbitrary",)),
    )(patches8, w18, gammas, betas, wfused, wbm, bbr)

    # channel-major permutation + flatten on a tiny tensor, fused by XLA in the jit:
    # (M, OUT_CH) -> (B, Lo, OUT_CH) -> (B, OUT_CH, Lo) -> (B, OUT_CH*Lo) == x.view(B,-1)
    return out.reshape(B, Lo, OUT_CH).transpose(0, 2, 1).reshape(B, -1)


def ref_forward(x, p):
    """Pure-JAX reference mirroring the PyTorch forward (training-mode BN)."""
    def conv1d(x, w, b=None, stride=1, padding=0):
        y = jax.lax.conv_general_dilated(
            x, w, (stride,), [(padding, padding)],
            dimension_numbers=("NCH", "OIH", "NCH"))
        if b is not None:
            y = y + b[None, :, None]
        return y

    def bn_relu(x, g, b):
        mu = jnp.mean(x, axis=(0, 2), keepdims=True)
        var = jnp.mean((x - mu) ** 2, axis=(0, 2), keepdims=True)
        y = (x - mu) / jnp.sqrt(var + EPS) * g[None, :, None] + b[None, :, None]
        return jnp.maximum(y, 0.0)

    h = conv1d(x, p["w1"], p["b1"], stride=STRIDE1)
    for i in range(2):
        y = bn_relu(h, p["gamma"][2 * i], p["beta"][2 * i])
        y = conv1d(y, p["wc"][2 * i], padding=1)
        y = bn_relu(y, p["gamma"][2 * i + 1], p["beta"][2 * i + 1])
        y = conv1d(y, p["wc"][2 * i + 1], padding=1)
        h = h + y
    h = conv1d(h, p["wb"], p["bb"])
    return h.reshape(x.shape[0], -1)


def make_params(key):
    C = HIDDEN
    ks = jax.random.split(key, 16)
    params = {
        "w1": jax.random.normal(ks[0], (C, 1, K1), jnp.float32) * 0.2,   # torch (out,in,k)
        "b1": jax.random.normal(ks[1], (C,), jnp.float32) * 0.1,
        "wc": [jax.random.normal(ks[2 + j], (C, C, 3), jnp.float32) * 0.05
               for j in range(4)],                                        # 2 convs / block
        "gamma": 1.0 + 0.1 * jax.random.normal(ks[6], (4, C), jnp.float32),
        "beta": 0.1 * jax.random.normal(ks[7], (4, C), jnp.float32),
        "wb": jax.random.normal(ks[8], (OUT_CH, C, 1), jnp.float32) * 0.1,
        "bb": jax.random.normal(ks[9], (OUT_CH,), jnp.float32) * 0.1,
    }
    return params


if __name__ == "__main__":
    key = jax.random.PRNGKey(0)
    pkey, xkey = jax.random.split(key)
    params = make_params(pkey)

    B, L_in = 2, 34          # -> Lo = (34 - 4)//2 + 1 = 16
    x = jax.random.normal(xkey, (B, 1, L_in), jnp.float32)

    out = jax.block_until_ready(subconvnet_forward(x, params))
    ref = jax.block_until_ready(ref_forward(x, params))

    assert out.shape == (B, OUT_CH * 16), out.shape
    # conv3 matmuls use bf16 operands (f32 accumulation) and BN uses one-pass stats;
    # 2e-2 comfortably covers that.
    np.testing.assert_allclose(np.asarray(out), np.asarray(ref), rtol=2e-2, atol=2e-2)
    print("KERNEL_OK")
</pallas_src>

<mosaic_0001>
module attributes {stable_mosaic.version = 11 : i64} {
  func.func @subconv_kernel(%arg0: i32, %arg1: memref<32x8xf32, #tpu.memory_space<vmem>>, %arg2: memref<8x64xf32, #tpu.memory_space<vmem>>, %arg3: memref<4x64xf32, #tpu.memory_space<vmem>>, %arg4: memref<4x64xf32, #tpu.memory_space<vmem>>, %arg5: memref<4x192x64xbf16, #tpu.memory_space<vmem>>, %arg6: memref<64x4xf32, #tpu.memory_space<vmem>>, %arg7: memref<1x4xf32, #tpu.memory_space<vmem>>, %arg8: memref<32x4xf32, #tpu.memory_space<vmem>>) attributes {dimension_semantics = [#tpu.dimension_semantics<arbitrary>], iteration_bounds = array<i64: 1>, scalar_prefetch = 0 : i64, scratch_operands = 0 : i64, tpu.core_type = #tpu.core_type<tc>, window_params = [{pipeline_mode = #tpu.pipeline_mode<synchronous>, transform_indices = @transform_0, window_bounds = array<i64: 32, 8>}, {pipeline_mode = #tpu.pipeline_mode<synchronous>, transform_indices = @transform_1, window_bounds = array<i64: 8, 64>}, {pipeline_mode = #tpu.pipeline_mode<synchronous>, transform_indices = @transform_2, window_bounds = array<i64: 4, 64>}, {pipeline_mode = #tpu.pipeline_mode<synchronous>, transform_indices = @transform_3, window_bounds = array<i64: 4, 64>}, {pipeline_mode = #tpu.pipeline_mode<synchronous>, transform_indices = @transform_4, window_bounds = array<i64: 4, 192, 64>}, {pipeline_mode = #tpu.pipeline_mode<synchronous>, transform_indices = @transform_5, window_bounds = array<i64: 64, 4>}, {pipeline_mode = #tpu.pipeline_mode<synchronous>, transform_indices = @transform_6, window_bounds = array<i64: 1, 4>}, {pipeline_mode = #tpu.pipeline_mode<synchronous>, transform_indices = @transform_7, window_bounds = array<i64: 32, 4>}]} {
    %0 = tpu.iota {dimensions = array<i32: 1>} : vector<2x16x64xi32>
    %1 = vector.shape_cast %0 : vector<2x16x64xi32> to vector<32x64xi32>
    %c0_i32 = arith.constant 0 : i32
    %2 = vector.broadcast %c0_i32 : i32 to vector<32x64xi32>
    %3 = arith.cmpi eq, %1, %2 : vector<32x64xi32>
    %c15_i32 = arith.constant 15 : i32
    %4 = vector.broadcast %c15_i32 : i32 to vector<32x64xi32>
    %5 = arith.cmpi eq, %1, %4 : vector<32x64xi32>
    %c0 = arith.constant 0 : index
    %c0_0 = arith.constant 0 : index
    %6 = vector.load %arg1[%c0, %c0_0] : memref<32x8xf32, #tpu.memory_space<vmem>>, vector<32x8xf32>
    %c0_1 = arith.constant 0 : index
    %c0_2 = arith.constant 0 : index
    %7 = vector.load %arg2[%c0_1, %c0_2] : memref<8x64xf32, #tpu.memory_space<vmem>>, vector<8x64xf32>
    %cst = arith.constant dense<0.000000e+00> : vector<32x64xf32>
    %8 = tpu.matmul %6, %7, %cst {dimension_numbers = #tpu.dot_dimension_numbers<[1], [0], [0], [1], [0, 0, 1, 1], [], []>} : vector<32x8xf32>, vector<8x64xf32>, vector<32x64xf32> -> vector<32x64xf32>
    %c0_3 = arith.constant 0 : index
    %c0_4 = arith.constant 0 : index
    %9 = vector.load %arg3[%c0_3, %c0_4] : memref<4x64xf32, #tpu.memory_space<vmem>>, vector<1x64xf32>
    %10 = vector.shape_cast %9 : vector<1x64xf32> to vector<64xf32>
    %c0_5 = arith.constant 0 : index
    %c0_6 = arith.constant 0 : index
    %11 = vector.load %arg4[%c0_5, %c0_6] : memref<4x64xf32, #tpu.memory_space<vmem>>, vector<1x64xf32>
    %12 = vector.shape_cast %11 : vector<1x64xf32> to vector<64xf32>
    %cst_7 = arith.constant dense<0.000000e+00> : vector<64xf32>
    %13 = vector.multi_reduction <add>, %8, %cst_7 [0] : vector<32x64xf32> to vector<64xf32>
    %14 = vector.shape_cast %13 : vector<64xf32> to vector<1x64xf32>
    %cst_8 = arith.constant 3.200000e+01 : f32
    %15 = vector.broadcast %cst_8 : f32 to vector<1x64xf32>
    %16 = arith.divf %14, %15 : vector<1x64xf32>
    %17 = arith.mulf %8, %8 : vector<32x64xf32>
    %cst_9 = arith.constant dense<0.000000e+00> : vector<64xf32>
    %18 = vector.multi_reduction <add>, %17, %cst_9 [0] : vector<32x64xf32> to vector<64xf32>
    %19 = vector.shape_cast %18 : vector<64xf32> to vector<1x64xf32>
    %cst_10 = arith.constant 3.200000e+01 : f32
    %20 = vector.broadcast %cst_10 : f32 to vector<1x64xf32>
    %21 = arith.divf %19, %20 : vector<1x64xf32>
    %22 = arith.mulf %16, %16 : vector<1x64xf32>
    %23 = arith.subf %21, %22 : vector<1x64xf32>
    %cst_11 = arith.constant 9.99999974E-6 : f32
    %24 = vector.broadcast %cst_11 : f32 to vector<1x64xf32>
    %25 = arith.addf %23, %24 : vector<1x64xf32>
    %26 = math.rsqrt %25 : vector<1x64xf32>
    %27 = vector.shape_cast %10 : vector<64xf32> to vector<1x64xf32>
    %28 = arith.mulf %26, %27 : vector<1x64xf32>
    %29 = arith.mulf %16, %28 : vector<1x64xf32>
    %30 = vector.shape_cast %12 : vector<64xf32> to vector<1x64xf32>
    %31 = arith.subf %30, %29 : vector<1x64xf32>
    %32 = vector.broadcast %28 : vector<1x64xf32> to vector<32x64xf32>
    %33 = arith.mulf %8, %32 : vector<32x64xf32>
    %34 = vector.broadcast %31 : vector<1x64xf32> to vector<32x64xf32>
    %35 = arith.addf %33, %34 : vector<32x64xf32>
    %cst_12 = arith.constant 0.000000e+00 : f32
    %36 = vector.broadcast %cst_12 : f32 to vector<32x64xf32>
    %37 = arith.maximumf %35, %36 : vector<32x64xf32>
    %c0_13 = arith.constant 0 : index
    %c0_14 = arith.constant 0 : index
    %c0_15 = arith.constant 0 : index
    %38 = vector.load %arg5[%c0_13, %c0_14, %c0_15] : memref<4x192x64xbf16, #tpu.memory_space<vmem>>, vector<1x192x64xbf16>
    %39 = vector.shape_cast %38 : vector<1x192x64xbf16> to vector<192x64xbf16>
    %c1_i32 = arith.constant 1 : i32
    %40 = tpu.dynamic_rotate %37 by %c1_i32 dim 0 : vector<32x64xf32>, i32 -> vector<32x64xf32>
    %cst_16 = arith.constant 0.000000e+00 : f32
    %41 = vector.broadcast %cst_16 : f32 to vector<32x64xf32>
    %42 = arith.select %3, %41, %40 : vector<32x64xi1>, vector<32x64xf32>
    %c31_i32 = arith.constant 31 : i32
    %43 = tpu.dynamic_rotate %37 by %c31_i32 dim 0 : vector<32x64xf32>, i32 -> vector<32x64xf32>
    %cst_17 = arith.constant 0.000000e+00 : f32
    %44 = vector.broadcast %cst_17 : f32 to vector<32x64xf32>
    %45 = arith.select %5, %44, %43 : vector<32x64xi1>, vector<32x64xf32>
    %46 = arith.truncf %42 : vector<32x64xf32> to vector<32x64xbf16>
    %47 = arith.truncf %37 : vector<32x64xf32> to vector<32x64xbf16>
    %48 = arith.truncf %45 : vector<32x64xf32> to vector<32x64xbf16>
    %49 = tpu.concatenate %46, %47, %48 in 1 : vector<32x64xbf16>, vector<32x64xbf16>, vector<32x64xbf16> -> vector<32x192xbf16>
    %cst_18 = arith.constant dense<0.000000e+00> : vector<32x64xf32>
    %50 = tpu.matmul %49, %39, %cst_18 {dimension_numbers = #tpu.dot_dimension_numbers<[1], [0], [0], [1], [0, 0, 1, 1], [], []>} : vector<32x192xbf16>, vector<192x64xbf16>, vector<32x64xf32> -> vector<32x64xf32>
    %c1 = arith.constant 1 : index
    %c0_19 = arith.constant 0 : index
    %51 = vector.load %arg3[%c1, %c0_19] : memref<4x64xf32, #tpu.memory_space<vmem>>, vector<1x64xf32>
    %52 = vector.shape_cast %51 : vector<1x64xf32> to vector<64xf32>
    %c1_20 = arith.constant 1 : index
    %c0_21 = arith.constant 0 : index
    %53 = vector.load %arg4[%c1_20, %c0_21] : memref<4x64xf32, #tpu.memory_space<vmem>>, vector<1x64xf32>
    %54 = vector.shape_cast %53 : vector<1x64xf32> to vector<64xf32>
    %cst_22 = arith.constant dense<0.000000e+00> : vector<64xf32>
    %55 = vector.multi_reduction <add>, %50, %cst_22 [0] : vector<32x64xf32> to vector<64xf32>
    %56 = vector.shape_cast %55 : vector<64xf32> to vector<1x64xf32>
    %cst_23 = arith.constant 3.200000e+01 : f32
    %57 = vector.broadcast %cst_23 : f32 to vector<1x64xf32>
    %58 = arith.divf %56, %57 : vector<1x64xf32>
    %59 = arith.mulf %50, %50 : vector<32x64xf32>
    %cst_24 = arith.constant dense<0.000000e+00> : vector<64xf32>
    %60 = vector.multi_reduction <add>, %59, %cst_24 [0] : vector<32x64xf32> to vector<64xf32>
    %61 = vector.shape_cast %60 : vector<64xf32> to vector<1x64xf32>
    %cst_25 = arith.constant 3.200000e+01 : f32
    %62 = vector.broadcast %cst_25 : f32 to vector<1x64xf32>
    %63 = arith.divf %61, %62 : vector<1x64xf32>
    %64 = arith.mulf %58, %58 : vector<1x64xf32>
    %65 = arith.subf %63, %64 : vector<1x64xf32>
    %cst_26 = arith.constant 9.99999974E-6 : f32
    %66 = vector.broadcast %cst_26 : f32 to vector<1x64xf32>
    %67 = arith.addf %65, %66 : vector<1x64xf32>
    %68 = math.rsqrt %67 : vector<1x64xf32>
    %69 = vector.shape_cast %52 : vector<64xf32> to vector<1x64xf32>
    %70 = arith.mulf %68, %69 : vector<1x64xf32>
    %71 = arith.mulf %58, %70 : vector<1x64xf32>
    %72 = vector.shape_cast %54 : vector<64xf32> to vector<1x64xf32>
    %73 = arith.subf %72, %71 : vector<1x64xf32>
    %74 = vector.broadcast %70 : vector<1x64xf32> to vector<32x64xf32>
    %75 = arith.mulf %50, %74 : vector<32x64xf32>
    %76 = vector.broadcast %73 : vector<1x64xf32> to vector<32x64xf32>
    %77 = arith.addf %75, %76 : vector<32x64xf32>
    %cst_27 = arith.constant 0.000000e+00 : f32
    %78 = vector.broadcast %cst_27 : f32 to vector<32x64xf32>
    %79 = arith.maximumf %77, %78 : vector<32x64xf32>
    %c1_28 = arith.constant 1 : index
    %c0_29 = arith.constant 0 : index
    %c0_30 = arith.constant 0 : index
    %80 = vector.load %arg5[%c1_28, %c0_29, %c0_30] : memref<4x192x64xbf16, #tpu.memory_space<vmem>>, vector<1x192x64xbf16>
    %81 = vector.shape_cast %80 : vector<1x192x64xbf16> to vector<192x64xbf16>
    %c1_i32_31 = arith.constant 1 : i32
    %82 = tpu.dynamic_rotate %79 by %c1_i32_31 dim 0 : vector<32x64xf32>, i32 -> vector<32x64xf32>
    %cst_32 = arith.constant 0.000000e+00 : f32
    %83 = vector.broadcast %cst_32 : f32 to vector<32x64xf32>
    %84 = arith.select %3, %83, %82 : vector<32x64xi1>, vector<32x64xf32>
    %c31_i32_33 = arith.constant 31 : i32
    %85 = tpu.dynamic_rotate %79 by %c31_i32_33 dim 0 : vector<32x64xf32>, i32 -> vector<32x64xf32>
    %cst_34 = arith.constant 0.000000e+00 : f32
    %86 = vector.broadcast %cst_34 : f32 to vector<32x64xf32>
    %87 = arith.select %5, %86, %85 : vector<32x64xi1>, vector<32x64xf32>
    %88 = arith.truncf %84 : vector<32x64xf32> to vector<32x64xbf16>
    %89 = arith.truncf %79 : vector<32x64xf32> to vector<32x64xbf16>
    %90 = arith.truncf %87 : vector<32x64xf32> to vector<32x64xbf16>
    %91 = tpu.concatenate %88, %89, %90 in 1 : vector<32x64xbf16>, vector<32x64xbf16>, vector<32x64xbf16> -> vector<32x192xbf16>
    %cst_35 = arith.constant dense<0.000000e+00> : vector<32x64xf32>
    %92 = tpu.matmul %91, %81, %cst_35 {dimension_numbers = #tpu.dot_dimension_numbers<[1], [0], [0], [1], [0, 0, 1, 1], [], []>} : vector<32x192xbf16>, vector<192x64xbf16>, vector<32x64xf32> -> vector<32x64xf32>
    %93 = arith.addf %8, %92 : vector<32x64xf32>
    %c2 = arith.constant 2 : index
    %c0_36 = arith.constant 0 : index
    %94 = vector.load %arg3[%c2, %c0_36] : memref<4x64xf32, #tpu.memory_space<vmem>>, vector<1x64xf32>
    %95 = vector.shape_cast %94 : vector<1x64xf32> to vector<64xf32>
    %c2_37 = arith.constant 2 : index
    %c0_38 = arith.constant 0 : index
    %96 = vector.load %arg4[%c2_37, %c0_38] : memref<4x64xf32, #tpu.memory_space<vmem>>, vector<1x64xf32>
    %97 = vector.shape_cast %96 : vector<1x64xf32> to vector<64xf32>
    %cst_39 = arith.constant dense<0.000000e+00> : vector<64xf32>
    %98 = vector.multi_reduction <add>, %93, %cst_39 [0] : vector<32x64xf32> to vector<64xf32>
    %99 = vector.shape_cast %98 : vector<64xf32> to vector<1x64xf32>
    %cst_40 = arith.constant 3.200000e+01 : f32
    %100 = vector.broadcast %cst_40 : f32 to vector<1x64xf32>
    %101 = arith.divf %99, %100 : vector<1x64xf32>
    %102 = arith.mulf %93, %93 : vector<32x64xf32>
    %cst_41 = arith.constant dense<0.000000e+00> : vector<64xf32>
    %103 = vector.multi_reduction <add>, %102, %cst_41 [0] : vector<32x64xf32> to vector<64xf32>
    %104 = vector.shape_cast %103 : vector<64xf32> to vector<1x64xf32>
    %cst_42 = arith.constant 3.200000e+01 : f32
    %105 = vector.broadcast %cst_42 : f32 to vector<1x64xf32>
    %106 = arith.divf %104, %105 : vector<1x64xf32>
    %107 = arith.mulf %101, %101 : vector<1x64xf32>
    %108 = arith.subf %106, %107 : vector<1x64xf32>
    %cst_43 = arith.constant 9.99999974E-6 : f32
    %109 = vector.broadcast %cst_43 : f32 to vector<1x64xf32>
    %110 = arith.addf %108, %109 : vector<1x64xf32>
    %111 = math.rsqrt %110 : vector<1x64xf32>
    %112 = vector.shape_cast %95 : vector<64xf32> to vector<1x64xf32>
    %113 = arith.mulf %111, %112 : vector<1x64xf32>
    %114 = arith.mulf %101, %113 : vector<1x64xf32>
    %115 = vector.shape_cast %97 : vector<64xf32> to vector<1x64xf32>
    %116 = arith.subf %115, %114 : vector<1x64xf32>
    %117 = vector.broadcast %113 : vector<1x64xf32> to vector<32x64xf32>
    %118 = arith.mulf %93, %117 : vector<32x64xf32>
    %119 = vector.broadcast %116 : vector<1x64xf32> to vector<32x64xf32>
    %120 = arith.addf %118, %119 : vector<32x64xf32>
    %cst_44 = arith.constant 0.000000e+00 : f32
    %121 = vector.broadcast %cst_44 : f32 to vector<32x64xf32>
    %122 = arith.maximumf %120, %121 : vector<32x64xf32>
    %c2_45 = arith.constant 2 : index
    %c0_46 = arith.constant 0 : index
    %c0_47 = arith.constant 0 : index
    %123 = vector.load %arg5[%c2_45, %c0_46, %c0_47] : memref<4x192x64xbf16, #tpu.memory_space<vmem>>, vector<1x192x64xbf16>
    %124 = vector.shape_cast %123 : vector<1x192x64xbf16> to vector<192x64xbf16>
    %c1_i32_48 = arith.constant 1 : i32
    %125 = tpu.dynamic_rotate %122 by %c1_i32_48 dim 0 : vector<32x64xf32>, i32 -> vector<32x64xf32>
    %cst_49 = arith.constant 0.000000e+00 : f32
    %126 = vector.broadcast %cst_49 : f32 to vector<32x64xf32>
    %127 = arith.select %3, %126, %125 : vector<32x64xi1>, vector<32x64xf32>
    %c31_i32_50 = arith.constant 31 : i32
    %128 = tpu.dynamic_rotate %122 by %c31_i32_50 dim 0 : vector<32x64xf32>, i32 -> vector<32x64xf32>
    %cst_51 = arith.constant 0.000000e+00 : f32
    %129 = vector.broadcast %cst_51 : f32 to vector<32x64xf32>
    %130 = arith.select %5, %129, %128 : vector<32x64xi1>, vector<32x64xf32>
    %131 = arith.truncf %127 : vector<32x64xf32> to vector<32x64xbf16>
    %132 = arith.truncf %122 : vector<32x64xf32> to vector<32x64xbf16>
    %133 = arith.truncf %130 : vector<32x64xf32> to vector<32x64xbf16>
    %134 = tpu.concatenate %131, %132, %133 in 1 : vector<32x64xbf16>, vector<32x64xbf16>, vector<32x64xbf16> -> vector<32x192xbf16>
    %cst_52 = arith.constant dense<0.000000e+00> : vector<32x64xf32>
    %135 = tpu.matmul %134, %124, %cst_52 {dimension_numbers = #tpu.dot_dimension_numbers<[1], [0], [0], [1], [0, 0, 1, 1], [], []>} : vector<32x192xbf16>, vector<192x64xbf16>, vector<32x64xf32> -> vector<32x64xf32>
    %c3 = arith.constant 3 : index
    %c0_53 = arith.constant 0 : index
    %136 = vector.load %arg3[%c3, %c0_53] : memref<4x64xf32, #tpu.memory_space<vmem>>, vector<1x64xf32>
    %137 = vector.shape_cast %136 : vector<1x64xf32> to vector<64xf32>
    %c3_54 = arith.constant 3 : index
    %c0_55 = arith.constant 0 : index
    %138 = vector.load %arg4[%c3_54, %c0_55] : memref<4x64xf32, #tpu.memory_space<vmem>>, vector<1x64xf32>
    %139 = vector.shape_cast %138 : vector<1x64xf32> to vector<64xf32>
    %cst_56 = arith.constant dense<0.000000e+00> : vector<64xf32>
    %140 = vector.multi_reduction <add>, %135, %cst_56 [0] : vector<32x64xf32> to vector<64xf32>
    %141 = vector.shape_cast %140 : vector<64xf32> to vector<1x64xf32>
    %cst_57 = arith.constant 3.200000e+01 : f32
    %142 = vector.broadcast %cst_57 : f32 to vector<1x64xf32>
    %143 = arith.divf %141, %142 : vector<1x64xf32>
    %144 = arith.mulf %135, %135 : vector<32x64xf32>
    %cst_58 = arith.constant dense<0.000000e+00> : vector<64xf32>
    %145 = vector.multi_reduction <add>, %144, %cst_58 [0] : vector<32x64xf32> to vector<64xf32>
    %146 = vector.shape_cast %145 : vector<64xf32> to vector<1x64xf32>
    %cst_59 = arith.constant 3.200000e+01 : f32
    %147 = vector.broadcast %cst_59 : f32 to vector<1x64xf32>
    %148 = arith.divf %146, %147 : vector<1x64xf32>
    %149 = arith.mulf %143, %143 : vector<1x64xf32>
    %150 = arith.subf %148, %149 : vector<1x64xf32>
    %cst_60 = arith.constant 9.99999974E-6 : f32
    %151 = vector.broadcast %cst_60 : f32 to vector<1x64xf32>
    %152 = arith.addf %150, %151 : vector<1x64xf32>
    %153 = math.rsqrt %152 : vector<1x64xf32>
    %154 = vector.shape_cast %137 : vector<64xf32> to vector<1x64xf32>
    %155 = arith.mulf %153, %154 : vector<1x64xf32>
    %156 = arith.mulf %143, %155 : vector<1x64xf32>
    %157 = vector.shape_cast %139 : vector<64xf32> to vector<1x64xf32>
    %158 = arith.subf %157, %156 : vector<1x64xf32>
    %159 = vector.broadcast %155 : vector<1x64xf32> to vector<32x64xf32>
    %160 = arith.mulf %135, %159 : vector<32x64xf32>
    %161 = vector.broadcast %158 : vector<1x64xf32> to vector<32x64xf32>
    %162 = arith.addf %160, %161 : vector<32x64xf32>
    %cst_61 = arith.constant 0.000000e+00 : f32
    %163 = vector.broadcast %cst_61 : f32 to vector<32x64xf32>
    %164 = arith.maximumf %162, %163 : vector<32x64xf32>
    %c3_62 = arith.constant 3 : index
    %c0_63 = arith.constant 0 : index
    %c0_64 = arith.constant 0 : index
    %165 = vector.load %arg5[%c3_62, %c0_63, %c0_64] : memref<4x192x64xbf16, #tpu.memory_space<vmem>>, vector<1x192x64xbf16>
    %166 = vector.shape_cast %165 : vector<1x192x64xbf16> to vector<192x64xbf16>
    %c1_i32_65 = arith.constant 1 : i32
    %167 = tpu.dynamic_rotate %164 by %c1_i32_65 dim 0 : vector<32x64xf32>, i32 -> vector<32x64xf32>
    %cst_66 = arith.constant 0.000000e+00 : f32
    %168 = vector.broadcast %cst_66 : f32 to vector<32x64xf32>
    %169 = arith.select %3, %168, %167 : vector<32x64xi1>, vector<32x64xf32>
    %c31_i32_67 = arith.constant 31 : i32
    %170 = tpu.dynamic_rotate %164 by %c31_i32_67 dim 0 : vector<32x64xf32>, i32 -> vector<32x64xf32>
    %cst_68 = arith.constant 0.000000e+00 : f32
    %171 = vector.broadcast %cst_68 : f32 to vector<32x64xf32>
    %172 = arith.select %5, %171, %170 : vector<32x64xi1>, vector<32x64xf32>
    %173 = arith.truncf %169 : vector<32x64xf32> to vector<32x64xbf16>
    %174 = arith.truncf %164 : vector<32x64xf32> to vector<32x64xbf16>
    %175 = arith.truncf %172 : vector<32x64xf32> to vector<32x64xbf16>
    %176 = tpu.concatenate %173, %174, %175 in 1 : vector<32x64xbf16>, vector<32x64xbf16>, vector<32x64xbf16> -> vector<32x192xbf16>
    %cst_69 = arith.constant dense<0.000000e+00> : vector<32x64xf32>
    %177 = tpu.matmul %176, %166, %cst_69 {dimension_numbers = #tpu.dot_dimension_numbers<[1], [0], [0], [1], [0, 0, 1, 1], [], []>} : vector<32x192xbf16>, vector<192x64xbf16>, vector<32x64xf32> -> vector<32x64xf32>
    %178 = arith.addf %93, %177 : vector<32x64xf32>
    %c0_70 = arith.constant 0 : index
    %c0_71 = arith.constant 0 : index
    %179 = vector.load %arg6[%c0_70, %c0_71] : memref<64x4xf32, #tpu.memory_space<vmem>>, vector<64x4xf32>
    %cst_72 = arith.constant dense<0.000000e+00> : vector<32x4xf32>
    %180 = tpu.matmul %178, %179, %cst_72 {dimension_numbers = #tpu.dot_dimension_numbers<[1], [0], [0], [1], [0, 0, 1, 1], [], []>} : vector<32x64xf32>, vector<64x4xf32>, vector<32x4xf32> -> vector<32x4xf32>
    %c0_73 = arith.constant 0 : index
    %c0_74 = arith.constant 0 : index
    %181 = vector.load %arg7[%c0_73, %c0_74] : memref<1x4xf32, #tpu.memory_space<vmem>>, vector<1x4xf32>
    %182 = vector.broadcast %181 : vector<1x4xf32> to vector<32x4xf32>
    %183 = arith.addf %180, %182 : vector<32x4xf32>
    %c0_75 = arith.constant 0 : index
    %c0_76 = arith.constant 0 : index
    %184 = vector.load %arg8[%c0_75, %c0_76] : memref<32x4xf32, #tpu.memory_space<vmem>>, vector<32x4xf32>
    tpu.vector_store %arg8[%c0_75, %c0_76], %183 {strides = array<i32>} : memref<32x4xf32, #tpu.memory_space<vmem>>, vector<32x4xf32>,
    return
  }
  func.func @transform_0(%arg0: i32) -> (i32, i32) {
    %c0_i32 = arith.constant 0 : i32
    %c0_i32_0 = arith.constant 0 : i32
    %c0_i32_1 = arith.constant 0 : i32
    return %c0_i32, %c0_i32_0 : i32, i32
  }
  func.func @transform_1(%arg0: i32) -> (i32, i32) {
    %c0_i32 = arith.constant 0 : i32
    %c0_i32_0 = arith.constant 0 : i32
    %c0_i32_1 = arith.constant 0 : i32
    return %c0_i32, %c0_i32_0 : i32, i32
  }
  func.func @transform_2(%arg0: i32) -> (i32, i32) {
    %c0_i32 = arith.constant 0 : i32
    %c0_i32_0 = arith.constant 0 : i32
    %c0_i32_1 = arith.constant 0 : i32
    return %c0_i32, %c0_i32_0 : i32, i32
  }
  func.func @transform_3(%arg0: i32) -> (i32, i32) {
    %c0_i32 = arith.constant 0 : i32
    %c0_i32_0 = arith.constant 0 : i32
    %c0_i32_1 = arith.constant 0 : i32
    return %c0_i32, %c0_i32_0 : i32, i32
  }
  func.func @transform_4(%arg0: i32) -> (i32, i32, i32) {
    %c0_i32 = arith.constant 0 : i32
    %c0_i32_0 = arith.constant 0 : i32
    %c0_i32_1 = arith.constant 0 : i32
    %c0_i32_2 = arith.constant 0 : i32
    return %c0_i32, %c0_i32_0, %c0_i32_1 : i32, i32, i32
  }
  func.func @transform_5(%arg0: i32) -> (i32, i32) {
    %c0_i32 = arith.constant 0 : i32
    %c0_i32_0 = arith.constant 0 : i32
    %c0_i32_1 = arith.constant 0 : i32
    return %c0_i32, %c0_i32_0 : i32, i32
  }
  func.func @transform_6(%arg0: i32) -> (i32, i32) {
    %c0_i32 = arith.constant 0 : i32
    %c0_i32_0 = arith.constant 0 : i32
    %c0_i32_1 = arith.constant 0 : i32
    return %c0_i32, %c0_i32_0 : i32, i32
  }
  func.func @transform_7(%arg0: i32) -> (i32, i32) {
    %c0_i32 = arith.constant 0 : i32
    %c0_i32_0 = arith.constant 0 : i32
    %c0_i32_1 = arith.constant 0 : i32
    return %c0_i32, %c0_i32_0 : i32, i32
  }
}

</mosaic_0001>

<bundles_post_ra>
// kernel: subconvnet_forward.1
= control target key start
LH: loop header
LB: loop body
LE: loop exit
PB: predicated region body
PF: predicated region fallthrough
CT: control target
= control target key end

     0   :  { %vm39_vm0 = vcmask 64512   ;;  %v1555_v5 = vmov 0   ;;  %vm139_vm1 = vcmask 523264   ;;  %v27_v57 = vlaneseq  ;;  %s1556_s13 = smov 64   ;;  %s2099_s1 = inlined_call_operand.vmem [shape: f32[8,64], index: 1, kind: input, shape index: {}]   ;;  %s2100_s0 = inlined_call_operand.vmem [shape: f32[32,8], index: 0, kind: input, shape index: {}]   ;;  %s2101_s4 = inlined_call_operand.vmem [shape: bf16[4,192,64], index: 4, kind: input, shape index: {}]   ;;  %s2102_s2 = inlined_call_operand.vmem [shape: f32[4,64], index: 2, kind: input, shape index: {}]   ;;  %s2103_s3 = inlined_call_operand.vmem [shape: f32[4,64], index: 3, kind: input, shape index: {}]   ;;  %s2104_s5 = inlined_call_operand.vmem [shape: f32[64,4], index: 5, kind: input, shape index: {}]   ;;  %s2105_s6 = inlined_call_operand.vmem [shape: f32[1,4], index: 6, kind: input, shape index: {}]   ;;  %s2106_s7 = inlined_call_operand.vmem [shape: f32[32,4], index: 7, kind: output, shape index: {}]  }
   0x1   :  { %v38_v0 = vld [vmem:[%s2099_s1] sm:$0xff]  ;;  %v35_v2 = vld [vmem:[%s2100_s0 + $0x8] sm:$0xff]  ;;  %v36_v3 = vld [vmem:[%s2100_s0 + $0x10] sm:$0xff]  ;;  %348 = vmatprep.subr.bf16.mxu1 %v1555_v5  ;;  %vm1288_vm6 = vcmask 31744  }
   0x2   :  { %v34_v1 = vld [vmem:[%s2100_s0] sm:$0xff]  ;;  %1451 = vmatprep.subr.mxu0 %v38_v0  ;;  %v37_v4 = vld [vmem:[%s2100_s0 + $0x18] sm:$0xff]  ;;  %v1500_v7 = vld [vmem:[%s2101_s4 + $0x30] sm:$0xff]   ;;  %v1690_v58 = vshrl.u32 %v27_v57, 7 }
   0x3   :  { %1453 = vmatprep.mubr.msk.f32.mxu0 %vm39_vm0, %v34_v1  ;;  %1452 = vmatpush3.msra.mxu0 %v38_v0  ;;  %v1499_v6 = vld [vmem:[%s2101_s4 + $0x38] sm:$0xff]   ;;  %v1501_v8 = vld [vmem:[%s2101_s4 + $0x28] sm:$0xff]   ;;  %v1502_v9 = vld [vmem:[%s2101_s4 + $0x20] sm:$0xff]  }
   0x4   :  { %1454 = vmatmul.mubr.msk.f32.vlgmr.msra.gmra.mxu0 %vm39_vm0, %v35_v2  ;;  %605 = vmatprep.subr.bf16.mxu0 %v1555_v5  ;;  %v1503_v10 = vld [vmem:[%s2101_s4 + $0x18] sm:$0xff]   ;;  %v1504_v11 = vld [vmem:[%s2101_s4 + $0x10] sm:$0xff]   ;;  %v1505_v12 = vld [vmem:[%s2101_s4 + $0x8] sm:$0xff]   ;;  %v1696_v60 = vsub.s32 0, %v1690_v58  ;;  %vm228_vm2 = vcmp.lt.s32.totalorder %v1690_v58, 1  ;;  %vm241_vm4 = vcmp.lt.s32.totalorder %v1690_v58, 7 }
   0x5   :  { %1456 = vmatprep.mubr.msk.f32.mxu0 %vm39_vm0, %v36_v3  ;;  %349 = vmatpush1.bf16.msra.mxu1 %v1499_v6  ;;  %v1506_v13 = vld [vmem:[%s2101_s4] sm:$0xff]   ;;  %v1507_v14 = vld [vmem:[%s2101_s4 + $0x58] sm:$0xff]   ;;  %v1508_v15 = vld [vmem:[%s2101_s4 + $0x50] sm:$0xff]   ;;  %vm30_vm5 = vcmp.eq.s32.totalorder %v1690_v58, 0 }
   0x6   :  { %350 = vmatprep.subr.bf16.mxu1 %v1555_v5  ;;  %v1509_v16 = vld [vmem:[%s2101_s4 + $0x48] sm:$0xff]   ;;  %v1510_v17 = vld [vmem:[%s2101_s4 + $0x40] sm:$0xff]   ;;  %v1516_v57 = vld [vmem:[%s2101_s4 + $0x70] sm:$0xff]  }
   0x7   :  { %v137_v59 = vld [vmem:[%s2102_s2] sm:$0x1] }
   0x8   :  { %1457 = vmatmul.mubr.msk.f32.gmra.mxu0 %vm39_vm0, %v37_v4  ;;  %v138_v63 = vld [vmem:[%s2103_s3] sm:$0x1] }
   0x9   :  { %351 = vmatpush1.bf16.msra.mxu1 %v1500_v7 }
   0xa   :  { %352 = vmatprep.subr.bf16.mxu1 %v1555_v5 }
   0xd   :  { %353 = vmatpush1.bf16.msra.mxu1 %v1501_v8 }
   0xe   :  { %354 = vmatprep.subr.bf16.mxu1 %v1555_v5 }
  0x11   :  { %355 = vmatpush1.bf16.msra.mxu1 %v1502_v9  ;;  %v1708_v9 = vadd.s32 8, %v1690_v58 }
  0x12   :  { %356 = vmatprep.subr.bf16.mxu1 %v1555_v5 }
  0x13   :  { %vm33_vm3 = vcmp.eq.s32.totalorder %v1708_v9, 15  ;;  %v1180_v9 = vld [vmem:[%s2104_s5 + $0x20] sm:$0xff] }
  0x15   :  { %357 = vmatpush1.bf16.msra.mxu1 %v1503_v10 }
  0x16   :  { %358 = vmatprep.subr.bf16.mxu1 %v1555_v5 }
  0x19   :  { %359 = vmatpush1.bf16.msra.mxu1 %v1504_v11 }
  0x1a   :  { %360 = vmatprep.subr.bf16.mxu1 %v1555_v5 }
  0x1d   :  { %361 = vmatpush1.bf16.msra.mxu1 %v1505_v12 }
  0x1e   :  { %362 = vmatprep.subr.bf16.mxu1 %v1555_v5 }
  0x21   :  { %363 = vmatpush1.bf16.msra.mxu1 %v1506_v13 }
  0x22   :  { %372 = vmatprep.subr.bf16.mxu1 %v1555_v5 }
  0x25   :  { %373 = vmatpush2.bf16.msra.mxu1 %v1507_v14 }
  0x26   :  { %374 = vmatprep.subr.bf16.mxu1 %v1555_v5 }
  0x29   :  { %375 = vmatpush2.bf16.msra.mxu1 %v1508_v15 }
  0x2a   :  { %376 = vmatprep.subr.bf16.mxu1 %v1555_v5 }
  0x2d   :  { %377 = vmatpush2.bf16.msra.mxu1 %v1509_v16 }
  0x2e   :  { %378 = vmatprep.subr.bf16.mxu1 %v1555_v5 }
  0x31   :  { %379 = vmatpush2.bf16.msra.mxu1 %v1510_v17 }
  0x32   :  { %866 = vmatprep.subr.bf16.mxu1 %v1555_v5 }
  0xc4   :  { %v1662_v18 = vpop.f32.mrf.mxu0 }
  0xc5   :  { %v156_v20 = vmul.f32 %v1662_v18, %v1662_v18  ;;  %v141_v24 = vsel %vm139_vm1, %v1662_v18, 0.0 }
  0xc6   :  { %v1664_v19 = vpop.f32.mrf.mxu0 }
  0xc7   :  { %v140_v21 = vsel %vm139_vm1, %v1664_v19, 0.0  ;;  %v155_v22 = vmul.f32 %v1664_v19, %v1664_v19  ;;  %v160_v28 = vsel %vm139_vm1, %v156_v20, 0.0 }
  0xc8   :  { %v1672_v23 = vpop.f32.mrf.mxu0  ;;  %v142_v26 = vadd.f32 %v141_v24, %v140_v21 }
  0xc9   :  { %v159_v25 = vsel %vm139_vm1, %v155_v22, 0.0  ;;  %v158_v29 = vmul.f32 %v1672_v23, %v1672_v23  ;;  %v145_v34 = vsel %vm139_vm1, %v1672_v23, 0.0 }
  0xca   :  { %v1677_v27 = vpop.f32.mrf.mxu0  ;;  %v161_v32 = vadd.f32 %v160_v28, %v159_v25 }
  0xcb   :  { %v143_v30 = vsel %vm139_vm1, %v1677_v27, 0.0  ;;  %v157_v31 = vmul.f32 %v1677_v27, %v1677_v27  ;;  %v164_v38 = vsel %vm139_vm1, %v158_v29, 0.0 }
  0xcc   :  { %v144_v33 = vadd.f32 %v143_v30, %v142_v26 }
  0xcd   :  { %v162_v35 = vsel %vm139_vm1, %v157_v31, 0.0 }
  0xce   :  { %v146_v36 = vadd.f32 %v145_v34, %v144_v33  ;;  %v163_v37 = vadd.f32 %v162_v35, %v161_v32 }
  0xd0   :  { %v147_v39 = vrot.slane %v146_v36, 4  ;;  %v165_v40 = vadd.f32 %v164_v38, %v163_v37 }
  0xd2   :  { %v148_v41 = vadd.f32 %v147_v39, %v146_v36  ;;  %v166_v42 = vrot.slane %v165_v40, 4 }
  0xd4   :  { %v149_v43 = vrot.slane %v148_v41, 2  ;;  %v167_v44 = vadd.f32 %v166_v42, %v165_v40 }
  0xd6   :  { %v150_v45 = vadd.f32 %v149_v43, %v148_v41  ;;  %v168_v46 = vrot.slane %v167_v44, 2 }
  0xd8   :  { %v151_v47 = vrot.slane %v150_v45, 1  ;;  %v169_v48 = vadd.f32 %v168_v46, %v167_v44 }
  0xda   :  { %v152_v49 = vadd.f32 %v151_v47, %v150_v45  ;;  %v170_v50 = vrot.slane %v169_v48, 1 }
  0xdc   :  { %v154_v51 = vmul.f32 0.03125, %v152_v49  ;;  %v171_v52 = vadd.f32 %v170_v50, %v169_v48 }
  0xde   :  { %v172_v53 = vmul.f32 0.03125, %v171_v52  ;;  %v173_v54 = vmul.f32 %v154_v51, %v154_v51  ;;  %v1511_v52 = vld [vmem:[%s2101_s4 + $0x98] sm:$0xff]  }
  0xdf   :  { %606 = vmatpush1.bf16.msra.mxu0 %v1511_v52 }
  0xe0   :  { %v174_v55 = vsub.f32 %v172_v53, %v173_v54  ;;  %v1512_v53 = vld [vmem:[%s2101_s4 + $0x90] sm:$0xff]   ;;  %607 = vmatprep.subr.bf16.mxu0 %v1555_v5  ;;  %v1513_v54 = vld [vmem:[%s2101_s4 + $0x88] sm:$0xff]  }
  0xe2   :  { %v175_v56 = vadd.f32 1e-05, %v174_v55  ;;  %v1514_v55 = vld [vmem:[%s2101_s4 + $0x80] sm:$0xff]  }
  0xe3   :  { %608 = vmatpush1.bf16.msra.mxu0 %v1512_v53 }
  0xe4   :  { %1547 = vrsqrt.f32 %v175_v56  ;;  %609 = vmatprep.subr.bf16.mxu0 %v1555_v5  ;;  %v1515_v56 = vld [vmem:[%s2101_s4 + $0x78] sm:$0xff]  }
  0xe7   :  { %610 = vmatpush1.bf16.msra.mxu0 %v1513_v54  ;;  %v398_v54 = vld [vmem:[%s2103_s3 + $0x1] sm:$0x1] }
  0xe8   :  { %611 = vmatprep.subr.bf16.mxu0 %v1555_v5 }
  0xeb   :  { %612 = vmatpush1.bf16.msra.mxu0 %v1514_v55 }
  0xec   :  { %613 = vmatprep.subr.bf16.mxu0 %v1555_v5 }
  0xef   :  { %614 = vmatpush1.bf16.msra.mxu0 %v1515_v56 }
  0xf0   :  { %615 = vmatprep.subr.bf16.mxu0 %v1555_v5 }
  0xf1   :  { %v1548_v61 = vpop.eup %1547 }
  0xf2   :  { %v177_v62 = vmul.f32 %v1548_v61, %v137_v59  ;;  %v1517_v59 = vld [vmem:[%s2101_s4 + $0x68] sm:$0xff]   ;;  %v1518_v61 = vld [vmem:[%s2101_s4 + $0x60] sm:$0xff]  }
  0xf3   :  { %616 = vmatpush1.bf16.msra.mxu0 %v1516_v57 }
  0xf4   :  { %v178_v0 = vmul.f32 %v177_v62, %v154_v51  ;;  %v183_v1 = vrot.slane %v177_v62, %v1696_v60  ;;  %617 = vmatprep.subr.bf16.mxu0 %v1555_v5  ;;  %v1519_v62 = vld [vmem:[%s2101_s4 + $0xb8] sm:$0xff]  }
  0xf6   :  { %v179_v2 = vsub.f32 %v138_v63, %v178_v0  ;;  %v186_v3 = vmul.f32 %v183_v1, %v1677_v27  ;;  %v184_v6 = vmul.f32 %v183_v1, %v1664_v19  ;;  %v185_v7 = vmul.f32 %v1662_v18, %v183_v1  ;;  %v1520_v63 = vld [vmem:[%s2101_s4 + $0xb0] sm:$0xff]   ;;  %v1521_v0 = vld [vmem:[%s2101_s4 + $0xa8] sm:$0xff]  }
  0xf7   :  { %v187_v8 = vmul.f32 %v1672_v23, %v183_v1  ;;  %618 = vmatpush1.bf16.msra.mxu0 %v1517_v59  ;;  %v1522_v1 = vld [vmem:[%s2101_s4 + $0xa0] sm:$0xff]  }
  0xf8   :  { %v191_v4 = vrot.slane %v179_v2, %v1696_v60  ;;  %619 = vmatprep.subr.bf16.mxu0 %v1555_v5 }
  0xfa   :  { %v194_v10 = vadd.f32 %v191_v4, %v186_v3  ;;  %v192_v11 = vadd.f32 %v191_v4, %v184_v6  ;;  %v193_v12 = vadd.f32 %v191_v4, %v185_v7  ;;  %v195_v13 = vadd.f32 %v191_v4, %v187_v8 }
  0xfb   :  { %620 = vmatpush1.bf16.msra.mxu0 %v1518_v61 }
  0xfc   :  { %v198_v14 = vmax.f32 %v194_v10, 0.0  ;;  %v196_v15 = vmax.f32 %v192_v11, 0.0  ;;  %v197_v16 = vmax.f32 %v193_v12, 0.0  ;;  %v199_v17 = vmax.f32 %v195_v13, 0.0  ;;  %629 = vmatprep.subr.bf16.mxu0 %v1555_v5 }
  0xfe   :  { %v225_v20 = vrot.slane %v197_v16, 7  ;;  %v252_v21 = vpack.c.bf16 %v197_v16, %v196_v15  ;;  %v224_v22 = vrot.slane %v196_v15, 7  ;;  %v237_v24 = vrot.slane %v196_v15, 1 }
  0xff   :  { %v238_v25 = vrot.slane %v197_v16, 1  ;;  %v239_v26 = vrot.slane %v198_v14, 1  ;;  %v227_v28 = vrot.slane %v199_v17, 7  ;;  %v240_v30 = vrot.slane %v199_v17, 1  ;;  %630 = vmatpush2.bf16.msra.mxu0 %v1519_v62 }
 0x100   :  { %258 = vrot.lane.b32.xlu0 %v252_v21, %s1556_s13  ;;  %v231_v29 = vsel %vm228_vm2, %v224_v22, %v225_v20  ;;  %v226_v31 = vrot.slane %v198_v14, 7  ;;  %v253_v32 = vpack.c.bf16 %v199_v17, %v198_v14  ;;  %631 = vmatprep.subr.bf16.mxu0 %v1555_v5 }
 0x101   :  { %v243_v33 = vsel %vm241_vm4, %v238_v25, %v239_v26  ;;  %v244_v34 = vsel %vm241_vm4, %v237_v24, %v238_v25  ;;  %v232_v35 = vsel %vm228_vm2, %v227_v28, %v224_v22  ;;  %v242_v38 = vsel %vm241_vm4, %v239_v26, %v240_v30 }
 0x102   :  { %v247_v36 = vsel %vm33_vm3, 0.0, %v243_v33  ;;  %v233_v37 = vsel %vm30_vm5, 0.0, %v232_v35  ;;  %v245_v39 = vsel %vm241_vm4, %v240_v30, %v237_v24  ;;  %v229_v43 = vsel %vm228_vm2, %v226_v31, %v227_v28 }
 0x103   :  { %v254_v40 = vpack.c.bf16 %v247_v36, %v244_v34  ;;  %v250_v41 = vpack.c.bf16 %v231_v29, %v233_v37  ;;  %v249_v42 = vsel %vm33_vm3, 0.0, %v245_v39  ;;  %v230_v45 = vsel %vm228_vm2, %v225_v20, %v226_v31  ;;  %632 = vmatpush2.bf16.msra.mxu0 %v1520_v63 }
 0x104   :  { %260 = vrot.lane.b32.xlu0 %v253_v32, %s1556_s13  ;;  %v255_v44 = vpack.c.bf16 %v249_v42, %v242_v38  ;;  %v235_v46 = vsel %vm30_vm5, 0.0, %v230_v45  ;;  %633 = vmatprep.subr.bf16.mxu0 %v1555_v5 }
 0x105   :  { %1313 = vmatprep.mubr.msk.bf16.mxu1 %vm139_vm1, %v254_v40  ;;  %v251_v47 = vpack.c.bf16 %v229_v43, %v235_v46 }
 0x107   :  { %634 = vmatpush2.bf16.msra.mxu0 %v1521_v0 }
 0x108   :  { %635 = vmatprep.subr.bf16.mxu0 %v1555_v5 }
 0x10b   :  { %636 = vmatpush2.bf16.msra.mxu0 %v1522_v1 }
 0x10c   :  { %1123 = vmatprep.subr.bf16.mxu0 %v1555_v5 }
 0x172   :  { %v259_v48 = vpop.permute.xlu0 %258 }
 0x173   :  { %v264_v49 = vsel %vm139_vm1, %v250_v41, %v259_v48 }
 0x174   :  { %381 = vmatmul.mubr.bf16.vlgmr.msra.gmra.mxu1 %v264_v49 }
 0x175   :  { %1314 = vmatprep.mubr.msk.bf16.mxu1 %vm139_vm1, %v255_v44 }
 0x176   :  { %v261_v50 = vpop.permute.xlu0 %260 }
 0x177   :  { %v268_v51 = vsel %vm139_vm1, %v251_v47, %v261_v50 }
 0x17c   :  { %389 = vmatmul.mubr.bf16.gmra.mxu1 %v268_v51  ;;  %v397_v51 = vld [vmem:[%s2102_s2 + $0x1] sm:$0x1] }
 0x234   :  { %v382_v2 = vpop.f32.mrf.mxu1 }
 0x235   :  { %v413_v8 = vmul.f32 %v382_v2, %v382_v2  ;;  %v399_v12 = vsel %vm139_vm1, %v382_v2, 0.0 }
 0x236   :  { %v384_v3 = vpop.f32.mrf.mxu1 }
 0x237   :  { %v417_v20 = vsel %vm139_vm1, %v413_v8, 0.0 }
 0x238   :  { %v385_v4 = vpop.f32.mrf.mxu1 }
 0x239   :  { %v414_v6 = vmul.f32 %v385_v4, %v385_v4  ;;  %v400_v10 = vsel %vm139_vm1, %v385_v4, 0.0 }
 0x23a   :  { %v387_v7 = vpop.f32.mrf.mxu1  ;;  %v401_v16 = vadd.f32 %v400_v10, %v399_v12 }
 0x23b   :  { %v418_v13 = vsel %vm139_vm1, %v414_v6, 0.0 }
 0x23c   :  { %v390_v11 = vpop.f32.mrf.mxu1  ;;  %v419_v22 = vadd.f32 %v418_v13, %v417_v20 }
 0x23d   :  { %v402_v14 = vsel %vm139_vm1, %v390_v11, 0.0  ;;  %v415_v15 = vmul.f32 %v390_v11, %v390_v11 }
 0x23e   :  { %v392_v17 = vpop.f32.mrf.mxu1  ;;  %v403_v24 = vadd.f32 %v402_v14, %v401_v16 }
 0x23f   :  { %v420_v21 = vsel %vm139_vm1, %v415_v15, 0.0 }
 0x240   :  { %v393_v25 = vpop.f32.mrf.mxu1  ;;  %v421_v29 = vadd.f32 %v420_v21, %v419_v22 }
 0x241   :  { %v404_v26 = vsel %vm139_vm1, %v393_v25, 0.0  ;;  %v416_v28 = vmul.f32 %v393_v25, %v393_v25 }
 0x242   :  { %v405_v30 = vadd.f32 %v404_v26, %v403_v24  ;;  %v395_v31 = vpop.f32.mrf.mxu1 }
 0x243   :  { %v422_v32 = vsel %vm139_vm1, %v416_v28, 0.0 }
 0x244   :  { %v406_v33 = vrot.slane %v405_v30, 4  ;;  %v423_v34 = vadd.f32 %v422_v32, %v421_v29 }
 0x246   :  { %v407_v35 = vadd.f32 %v406_v33, %v405_v30  ;;  %v424_v36 = vrot.slane %v423_v34, 4 }
 0x248   :  { %v408_v37 = vrot.slane %v407_v35, 2  ;;  %v425_v38 = vadd.f32 %v424_v36, %v423_v34 }
 0x24a   :  { %v409_v39 = vadd.f32 %v408_v37, %v407_v35  ;;  %v426_v40 = vrot.slane %v425_v38, 2 }
 0x24c   :  { %v410_v41 = vrot.slane %v409_v39, 1  ;;  %v427_v42 = vadd.f32 %v426_v40, %v425_v38 }
 0x24e   :  { %v411_v43 = vadd.f32 %v410_v41, %v409_v39  ;;  %v428_v44 = vrot.slane %v427_v42, 1 }
 0x250   :  { %v412_v45 = vmul.f32 0.03125, %v411_v43  ;;  %v429_v46 = vadd.f32 %v428_v44, %v427_v42 }
 0x252   :  { %v430_v47 = vmul.f32 0.03125, %v429_v46  ;;  %v431_v48 = vmul.f32 %v412_v45, %v412_v45  ;;  %v1524_v46 = vld [vmem:[%s2101_s4 + $0xf0] sm:$0xff]  }
 0x254   :  { %v432_v49 = vsub.f32 %v430_v47, %v431_v48  ;;  %v1525_v47 = vld [vmem:[%s2101_s4 + $0xe8] sm:$0xff]   ;;  %v1526_v48 = vld [vmem:[%s2101_s4 + $0xe0] sm:$0xff]  }
 0x256   :  { %v433_v50 = vadd.f32 1e-05, %v432_v49  ;;  %v1527_v49 = vld [vmem:[%s2101_s4 + $0xd8] sm:$0xff]  }
 0x258   :  { %1549 = vrsqrt.f32 %v433_v50  ;;  %v1528_v50 = vld [vmem:[%s2101_s4 + $0xd0] sm:$0xff]  }
 0x265   :  { %v1550_v52 = vpop.eup %1549 }
 0x266   :  { %v435_v53 = vmul.f32 %v1550_v52, %v397_v51  ;;  %v1529_v51 = vld [vmem:[%s2101_s4 + $0xc8] sm:$0xff]   ;;  %v1530_v52 = vld [vmem:[%s2101_s4 + $0xc0] sm:$0xff]  }
 0x268   :  { %v436_v55 = vmul.f32 %v435_v53, %v412_v45  ;;  %v441_v56 = vrot.slane %v435_v53, %v1696_v60  ;;  %v1523_v45 = vld [vmem:[%s2101_s4 + $0xf8] sm:$0xff]  }
 0x269   :  { %867 = vmatpush1.bf16.msra.mxu1 %v1523_v45  ;;  %v1531_v53 = vld [vmem:[%s2101_s4 + $0x118] sm:$0xff]  }
 0x26a   :  { %v437_v57 = vsub.f32 %v398_v54, %v436_v55  ;;  %v445_v59 = vmul.f32 %v441_v56, %v393_v25  ;;  %v442_v62 = vmul.f32 %v441_v56, %v382_v2  ;;  %v443_v63 = vmul.f32 %v441_v56, %v385_v4  ;;  %868 = vmatprep.subr.bf16.mxu1 %v1555_v5  ;;  %v1532_v54 = vld [vmem:[%s2101_s4 + $0x110] sm:$0xff]   ;;  %v1533_v55 = vld [vmem:[%s2101_s4 + $0x108] sm:$0xff]  }
 0x26b   :  { %v444_v0 = vmul.f32 %v441_v56, %v390_v11  ;;  %v1534_v56 = vld [vmem:[%s2101_s4 + $0x100] sm:$0xff]  }
 0x26c   :  { %v449_v61 = vrot.slane %v437_v57, %v1696_v60 }
 0x26d   :  { %869 = vmatpush1.bf16.msra.mxu1 %v1524_v46 }
 0x26e   :  { %v453_v1 = vadd.f32 %v449_v61, %v445_v59  ;;  %v450_v3 = vadd.f32 %v449_v61, %v442_v62  ;;  %v451_v6 = vadd.f32 %v449_v61, %v443_v63  ;;  %v452_v7 = vadd.f32 %v449_v61, %v444_v0  ;;  %870 = vmatprep.subr.bf16.mxu1 %v1555_v5 }
 0x270   :  { %v457_v8 = vmax.f32 %v453_v1, 0.0  ;;  %v454_v10 = vmax.f32 %v450_v3, 0.0  ;;  %v455_v12 = vmax.f32 %v451_v6, 0.0  ;;  %v456_v13 = vmax.f32 %v452_v7, 0.0 }
 0x271   :  { %871 = vmatpush1.bf16.msra.mxu1 %v1525_v47  ;;  %v659_v47 = vld [vmem:[%s2103_s3 + $0x2] sm:$0x1] }
 0x272   :  { %v486_v14 = vrot.slane %v457_v8, 7  ;;  %v498_v15 = vrot.slane %v457_v8, 1  ;;  %v484_v16 = vrot.slane %v455_v12, 7  ;;  %v496_v17 = vrot.slane %v455_v12, 1  ;;  %872 = vmatprep.subr.bf16.mxu1 %v1555_v5 }
 0x273   :  { %v509_v20 = vpack.c.bf16 %v455_v12, %v454_v10  ;;  %v483_v21 = vrot.slane %v454_v10, 7  ;;  %v495_v22 = vrot.slane %v454_v10, 1  ;;  %v497_v24 = vrot.slane %v456_v13, 1 }
 0x274   :  { %v510_v25 = vpack.c.bf16 %v457_v8, %v456_v13  ;;  %v485_v2 = vrot.slane %v456_v13, 7 }
 0x275   :  { %515 = vrot.lane.b32.xlu1 %v509_v20, %s1556_s13  ;;  %v500_v4 = vsel %vm241_vm4, %v496_v17, %v497_v24  ;;  %v501_v11 = vsel %vm241_vm4, %v495_v22, %v496_v17  ;;  %v489_v26 = vsel %vm228_vm2, %v483_v21, %v484_v16  ;;  %v490_v28 = vsel %vm228_vm2, %v486_v14, %v483_v21 }
 0x276   :  { %v504_v29 = vsel %vm33_vm3, 0.0, %v500_v4  ;;  %v491_v30 = vsel %vm30_vm5, 0.0, %v490_v28  ;;  %v499_v31 = vsel %vm241_vm4, %v497_v24, %v498_v15  ;;  %v502_v32 = vsel %vm241_vm4, %v498_v15, %v495_v22  ;;  %873 = vmatpush1.bf16.msra.mxu1 %v1526_v48 }
 0x277   :  { %v511_v33 = vpack.c.bf16 %v504_v29, %v501_v11  ;;  %v507_v34 = vpack.c.bf16 %v489_v26, %v491_v30  ;;  %v506_v35 = vsel %vm33_vm3, 0.0, %v502_v32  ;;  %v487_v36 = vsel %vm228_vm2, %v485_v2, %v486_v14  ;;  %874 = vmatprep.subr.bf16.mxu1 %v1555_v5 }
 0x278   :  { %v512_v37 = vpack.c.bf16 %v506_v35, %v499_v31  ;;  %v488_v38 = vsel %vm228_vm2, %v484_v16, %v485_v2 }
 0x279   :  { %517 = vrot.lane.b32.xlu1 %v510_v25, %s1556_s13  ;;  %1351 = vmatprep.mubr.msk.bf16.mxu0 %vm139_vm1, %v511_v33  ;;  %v493_v39 = vsel %vm30_vm5, 0.0, %v488_v38 }
 0x27a   :  { %v508_v40 = vpack.c.bf16 %v487_v36, %v493_v39  ;;  %875 = vmatpush1.bf16.msra.mxu1 %v1527_v49 }
 0x27b   :  { %876 = vmatprep.subr.bf16.mxu1 %v1555_v5 }
 0x27e   :  { %877 = vmatpush1.bf16.msra.mxu1 %v1528_v50 }
 0x27f   :  { %878 = vmatprep.subr.bf16.mxu1 %v1555_v5 }
 0x282   :  { %879 = vmatpush1.bf16.msra.mxu1 %v1529_v51 }
 0x283   :  { %880 = vmatprep.subr.bf16.mxu1 %v1555_v5 }
 0x286   :  { %881 = vmatpush1.bf16.msra.mxu1 %v1530_v52 }
 0x287   :  { %890 = vmatprep.subr.bf16.mxu1 %v1555_v5 }
 0x28a   :  { %891 = vmatpush2.bf16.msra.mxu1 %v1531_v53 }
 0x28b   :  { %892 = vmatprep.subr.bf16.mxu1 %v1555_v5 }
 0x28e   :  { %893 = vmatpush2.bf16.msra.mxu1 %v1532_v54 }
 0x28f   :  { %894 = vmatprep.subr.bf16.mxu1 %v1555_v5 }
 0x292   :  { %895 = vmatpush2.bf16.msra.mxu1 %v1533_v55 }
 0x293   :  { %896 = vmatprep.subr.bf16.mxu1 %v1555_v5 }
 0x296   :  { %897 = vmatpush2.bf16.msra.mxu1 %v1534_v56 }
 0x2e7   :  { %v516_v41 = vpop.permute.xlu1 %515 }
 0x2e8   :  { %v521_v42 = vsel %vm139_vm1, %v507_v34, %v516_v41 }
 0x2e9   :  { %638 = vmatmul.mubr.bf16.vlgmr.msra.gmra.mxu0 %v521_v42 }
 0x2ea   :  { %1352 = vmatprep.mubr.msk.bf16.mxu0 %vm139_vm1, %v512_v37 }
 0x2eb   :  { %v518_v43 = vpop.permute.xlu1 %517 }
 0x2ec   :  { %v525_v44 = vsel %vm139_vm1, %v508_v40, %v518_v43 }
 0x2f1   :  { %646 = vmatmul.mubr.bf16.gmra.mxu0 %v525_v44  ;;  %v658_v44 = vld [vmem:[%s2102_s2 + $0x2] sm:$0x1] }
 0x3a9   :  { %v639_v57 = vpop.f32.mrf.mxu0 }
 0x3aa   :  { %v1886_v62 = vadd.f32 %v639_v57, %v1664_v19 }
 0x3ab   :  { %v641_v59 = vpop.f32.mrf.mxu0 }
 0x3ac   :  { %v674_v6 = vmul.f32 %v1886_v62, %v1886_v62  ;;  %v660_v19 = vsel %vm139_vm1, %v1886_v62, 0.0 }
 0x3ad   :  { %v642_v61 = vpop.f32.mrf.mxu0 }
 0x3ae   :  { %v1889_v63 = vadd.f32 %v1662_v18, %v642_v61  ;;  %v678_v16 = vsel %vm139_vm1, %v674_v6, 0.0 }
 0x3af   :  { %v644_v0 = vpop.f32.mrf.mxu0 }
 0x3b0   :  { %v675_v1 = vmul.f32 %v1889_v63, %v1889_v63  ;;  %v661_v7 = vsel %vm139_vm1, %v1889_v63, 0.0 }
 0x3b1   :  { %v647_v3 = vpop.f32.mrf.mxu0  ;;  %v662_v14 = vadd.f32 %v661_v7, %v660_v19 }
 0x3b2   :  { %v1898_v8 = vadd.f32 %v647_v3, %v1677_v27  ;;  %v679_v18 = vsel %vm139_vm1, %v675_v1, 0.0 }
 0x3b3   :  { %v649_v10 = vpop.f32.mrf.mxu0  ;;  %v680_v20 = vadd.f32 %v679_v18, %v678_v16 }
 0x3b4   :  { %v663_v12 = vsel %vm139_vm1, %v1898_v8, 0.0  ;;  %v676_v13 = vmul.f32 %v1898_v8, %v1898_v8 }
 0x3b5   :  { %v650_v15 = vpop.f32.mrf.mxu0  ;;  %v664_v21 = vadd.f32 %v663_v12, %v662_v14 }
 0x3b6   :  { %v681_v17 = vsel %vm139_vm1, %v676_v13, 0.0  ;;  %v1910_v27 = vadd.f32 %v1672_v23, %v650_v15 }
 0x3b7   :  { %v652_v22 = vpop.f32.mrf.mxu0  ;;  %v682_v2 = vadd.f32 %v681_v17, %v680_v20 }
 0x3b8   :  { %v665_v24 = vsel %vm139_vm1, %v1910_v27, 0.0  ;;  %v677_v25 = vmul.f32 %v1910_v27, %v1910_v27 }
 0x3b9   :  { %v666_v4 = vadd.f32 %v665_v24, %v664_v21 }
 0x3ba   :  { %v683_v11 = vsel %vm139_vm1, %v677_v25, 0.0 }
 0x3bb   :  { %v667_v26 = vrot.slane %v666_v4, 4  ;;  %v684_v28 = vadd.f32 %v683_v11, %v682_v2 }
 0x3bd   :  { %v668_v29 = vadd.f32 %v667_v26, %v666_v4  ;;  %v685_v30 = vrot.slane %v684_v28, 4 }
 0x3bf   :  { %v669_v31 = vrot.slane %v668_v29, 2  ;;  %v686_v23 = vadd.f32 %v685_v30, %v684_v28 }
 0x3c1   :  { %v670_v32 = vadd.f32 %v669_v31, %v668_v29  ;;  %v687_v33 = vrot.slane %v686_v23, 2 }
 0x3c3   :  { %v671_v34 = vrot.slane %v670_v32, 1  ;;  %v688_v35 = vadd.f32 %v687_v33, %v686_v23 }
 0x3c5   :  { %v672_v36 = vadd.f32 %v671_v34, %v670_v32  ;;  %v689_v37 = vrot.slane %v688_v35, 1 }
 0x3c7   :  { %v673_v38 = vmul.f32 0.03125, %v672_v36  ;;  %v690_v39 = vadd.f32 %v689_v37, %v688_v35 }
 0x3c9   :  { %v691_v40 = vmul.f32 0.03125, %v690_v39  ;;  %v692_v41 = vmul.f32 %v673_v38, %v673_v38  ;;  %v1536_v39 = vld [vmem:[%s2101_s4 + $0x150] sm:$0xff]  }
 0x3cb   :  { %v693_v42 = vsub.f32 %v691_v40, %v692_v41  ;;  %v1537_v40 = vld [vmem:[%s2101_s4 + $0x148] sm:$0xff]   ;;  %v1538_v41 = vld [vmem:[%s2101_s4 + $0x140] sm:$0xff]  }
 0x3cd   :  { %v694_v43 = vadd.f32 1e-05, %v693_v42  ;;  %v1539_v42 = vld [vmem:[%s2101_s4 + $0x138] sm:$0xff]  }
 0x3cf   :  { %1551 = vrsqrt.f32 %v694_v43  ;;  %v1540_v43 = vld [vmem:[%s2101_s4 + $0x130] sm:$0xff]  }
 0x3dc   :  { %v1552_v45 = vpop.eup %1551 }
 0x3dd   :  { %v696_v46 = vmul.f32 %v1552_v45, %v658_v44  ;;  %v1541_v44 = vld [vmem:[%s2101_s4 + $0x128] sm:$0xff]   ;;  %v1542_v45 = vld [vmem:[%s2101_s4 + $0x120] sm:$0xff]  }
 0x3df   :  { %v697_v48 = vmul.f32 %v696_v46, %v673_v38  ;;  %v702_v49 = vrot.slane %v696_v46, %v1696_v60  ;;  %v1535_v38 = vld [vmem:[%s2101_s4 + $0x158] sm:$0xff]  }
 0x3e0   :  { %1124 = vmatpush1.bf16.msra.mxu0 %v1535_v38  ;;  %v1543_v46 = vld [vmem:[%s2101_s4 + $0x178] sm:$0xff]  }
 0x3e1   :  { %v698_v50 = vsub.f32 %v659_v47, %v697_v48  ;;  %v706_v51 = vmul.f32 %v702_v49, %v1910_v27  ;;  %v705_v52 = vmul.f32 %v702_v49, %v1898_v8  ;;  %v703_v54 = vmul.f32 %v702_v49, %v1886_v62  ;;  %1125 = vmatprep.subr.bf16.mxu0 %v1555_v5  ;;  %v1544_v47 = vld [vmem:[%s2101_s4 + $0x170] sm:$0xff]   ;;  %v1545_v48 = vld [vmem:[%s2101_s4 + $0x168] sm:$0xff]  }
 0x3e2   :  { %v704_v55 = vmul.f32 %v702_v49, %v1889_v63  ;;  %v1546_v49 = vld [vmem:[%s2101_s4 + $0x160] sm:$0xff]  }
 0x3e3   :  { %v710_v53 = vrot.slane %v698_v50, %v1696_v60 }
 0x3e4   :  { %1126 = vmatpush1.bf16.msra.mxu0 %v1536_v39  ;;  %v916_v39 = vld [vmem:[%s2103_s3 + $0x3] sm:$0x1] }
 0x3e5   :  { %v713_v56 = vadd.f32 %v710_v53, %v705_v52  ;;  %v714_v57 = vadd.f32 %v710_v53, %v706_v51  ;;  %v711_v59 = vadd.f32 %v710_v53, %v703_v54  ;;  %v712_v61 = vadd.f32 %v710_v53, %v704_v55  ;;  %1127 = vmatprep.subr.bf16.mxu0 %v1555_v5 }
 0x3e7   :  { %v717_v0 = vmax.f32 %v713_v56, 0.0  ;;  %v718_v1 = vmax.f32 %v714_v57, 0.0  ;;  %v715_v3 = vmax.f32 %v711_v59, 0.0  ;;  %v716_v6 = vmax.f32 %v712_v61, 0.0 }
 0x3e8   :  { %1128 = vmatpush1.bf16.msra.mxu0 %v1537_v40 }
 0x3e9   :  { %v771_v7 = vpack.c.bf16 %v718_v1, %v717_v0  ;;  %v758_v10 = vrot.slane %v717_v0, 1  ;;  %v770_v19 = vpack.c.bf16 %v716_v6, %v715_v3  ;;  %v756_v18 = vrot.slane %v715_v3, 1  ;;  %1129 = vmatprep.subr.bf16.mxu0 %v1555_v5 }
 0x3ea   :  { %v757_v12 = vrot.slane %v716_v6, 1  ;;  %v745_v13 = vrot.slane %v716_v6, 7  ;;  %v747_v14 = vrot.slane %v718_v1, 7  ;;  %v744_v15 = vrot.slane %v715_v3, 7 }
 0x3eb   :  { %778 = vrot.lane.b32.xlu1 %v771_v7, %s1556_s13  ;;  %776 = vrot.lane.b32.xlu0 %v770_v19, %s1556_s13  ;;  %v759_v16 = vrot.slane %v718_v1, 1  ;;  %v746_v17 = vrot.slane %v717_v0, 7 }
 0x3ec   :  { %v761_v20 = vsel %vm241_vm4, %v757_v12, %v758_v10  ;;  %v762_v21 = vsel %vm241_vm4, %v756_v18, %v757_v12  ;;  %v750_v22 = vsel %vm228_vm2, %v744_v15, %v745_v13  ;;  %v751_v24 = vsel %vm228_vm2, %v747_v14, %v744_v15  ;;  %1130 = vmatpush1.bf16.msra.mxu0 %v1538_v41 }
 0x3ed   :  { %v765_v25 = vsel %vm33_vm3, 0.0, %v761_v20  ;;  %v752_v2 = vsel %vm30_vm5, 0.0, %v751_v24  ;;  %v760_v4 = vsel %vm241_vm4, %v758_v10, %v759_v16  ;;  %v763_v11 = vsel %vm241_vm4, %v759_v16, %v756_v18  ;;  %1131 = vmatprep.subr.bf16.mxu0 %v1555_v5 }
 0x3ee   :  { %v772_v26 = vpack.c.bf16 %v765_v25, %v762_v21  ;;  %v768_v28 = vpack.c.bf16 %v750_v22, %v752_v2  ;;  %v767_v29 = vsel %vm33_vm3, 0.0, %v763_v11  ;;  %v748_v30 = vsel %vm228_vm2, %v746_v17, %v747_v14 }
 0x3ef   :  { %v773_v31 = vpack.c.bf16 %v767_v29, %v760_v4  ;;  %v749_v23 = vsel %vm228_vm2, %v745_v13, %v746_v17 }
 0x3f0   :  { %1389 = vmatprep.mubr.msk.bf16.mxu1 %vm139_vm1, %v772_v26  ;;  %v754_v32 = vsel %vm30_vm5, 0.0, %v749_v23  ;;  %1132 = vmatpush1.bf16.msra.mxu0 %v1539_v42 }
 0x3f1   :  { %v769_v33 = vpack.c.bf16 %v748_v30, %v754_v32  ;;  %1133 = vmatprep.subr.bf16.mxu0 %v1555_v5 }
 0x3f4   :  { %1134 = vmatpush1.bf16.msra.mxu0 %v1540_v43 }
 0x3f5   :  { %1135 = vmatprep.subr.bf16.mxu0 %v1555_v5 }
 0x3f8   :  { %1136 = vmatpush1.bf16.msra.mxu0 %v1541_v44 }
 0x3f9   :  { %1137 = vmatprep.subr.bf16.mxu0 %v1555_v5 }
 0x3fc   :  { %1138 = vmatpush1.bf16.msra.mxu0 %v1542_v45 }
 0x3fd   :  { %1147 = vmatprep.subr.bf16.mxu0 %v1555_v5 }
 0x400   :  { %1148 = vmatpush2.bf16.msra.mxu0 %v1543_v46 }
 0x401   :  { %1149 = vmatprep.subr.bf16.mxu0 %v1555_v5 }
 0x404   :  { %1150 = vmatpush2.bf16.msra.mxu0 %v1544_v47 }
 0x405   :  { %1151 = vmatprep.subr.bf16.mxu0 %v1555_v5 }
 0x408   :  { %1152 = vmatpush2.bf16.msra.mxu0 %v1545_v48 }
 0x409   :  { %1153 = vmatprep.subr.bf16.mxu0 %v1555_v5 }
 0x40c   :  { %1154 = vmatpush2.bf16.msra.mxu0 %v1546_v49 }
 0x45d   :  { %v777_v34 = vpop.permute.xlu0 %776  ;;  %v779_v36 = vpop.permute.xlu1 %778 }
 0x45e   :  { %v782_v35 = vsel %vm139_vm1, %v768_v28, %v777_v34  ;;  %v786_v37 = vsel %vm139_vm1, %v769_v33, %v779_v36  ;;  %v915_v36 = vld [vmem:[%s2102_s2 + $0x3] sm:$0x1] }
 0x45f   :  { %899 = vmatmul.mubr.bf16.vlgmr.msra.gmra.mxu1 %v782_v35 }
 0x460   :  { %1390 = vmatprep.mubr.msk.bf16.mxu1 %vm139_vm1, %v773_v31 }
 0x467   :  { %907 = vmatmul.mubr.bf16.gmra.mxu1 %v786_v37 }
 0x51f   :  { %v900_v50 = vpop.f32.mrf.mxu1 }
 0x520   :  { %v931_v55 = vmul.f32 %v900_v50, %v900_v50  ;;  %v917_v59 = vsel %vm139_vm1, %v900_v50, 0.0 }
 0x521   :  { %v902_v51 = vpop.f32.mrf.mxu1 }
 0x522   :  { %v935_v5 = vsel %vm139_vm1, %v931_v55, 0.0 }
 0x523   :  { %v903_v52 = vpop.f32.mrf.mxu1 }
 0x524   :  { %v932_v53 = vmul.f32 %v903_v52, %v903_v52  ;;  %v918_v56 = vsel %vm139_vm1, %v903_v52, 0.0 }
 0x525   :  { %v905_v54 = vpop.f32.mrf.mxu1  ;;  %v919_v3 = vadd.f32 %v918_v56, %v917_v59 }
 0x526   :  { %v936_v61 = vsel %vm139_vm1, %v932_v53, 0.0 }
 0x527   :  { %v908_v57 = vpop.f32.mrf.mxu1  ;;  %v937_v10 = vadd.f32 %v936_v61, %v935_v5 }
 0x528   :  { %v920_v0 = vsel %vm139_vm1, %v908_v57, 0.0  ;;  %v933_v1 = vmul.f32 %v908_v57, %v908_v57 }
 0x529   :  { %v910_v6 = vpop.f32.mrf.mxu1  ;;  %v921_v19 = vadd.f32 %v920_v0, %v919_v3 }
 0x52a   :  { %v938_v7 = vsel %vm139_vm1, %v933_v1, 0.0  ;;  %v1183_v6 = vld [vmem:[%s2104_s5 + $0x38] sm:$0xff] }
 0x52b   :  { %v911_v18 = vpop.f32.mrf.mxu1  ;;  %v939_v14 = vadd.f32 %v938_v7, %v937_v10  ;;  %1459 = vmatprep.subr.mxu0 %v1183_v6  ;;  %1481 = vmatprep.subr.mxu1 %v1183_v6 }
 0x52c   :  { %v922_v12 = vsel %vm139_vm1, %v911_v18, 0.0  ;;  %v934_v13 = vmul.f32 %v911_v18, %v911_v18  ;;  %1489 = vmatpush3.msra.mxu1 %v1183_v6 }
 0x52d   :  { %v923_v15 = vadd.f32 %v922_v12, %v921_v19  ;;  %v913_v16 = vpop.f32.mrf.mxu1  ;;  %v1182_v19 = vld [vmem:[%s2104_s5 + $0x30] sm:$0xff] }
 0x52e   :  { %v940_v17 = vsel %vm139_vm1, %v934_v13, 0.0  ;;  %1482 = vmatprep.subr.mxu1 %v1182_v19 }
 0x52f   :  { %v924_v20 = vrot.slane %v923_v15, 4  ;;  %v941_v21 = vadd.f32 %v940_v17, %v939_v14  ;;  %1490 = vmatpush3.msra.mxu1 %v1182_v19 }
 0x531   :  { %v925_v22 = vadd.f32 %v924_v20, %v923_v15  ;;  %v942_v24 = vrot.slane %v941_v21, 4  ;;  %v1181_v20 = vld [vmem:[%s2104_s5 + $0x28] sm:$0xff] }
 0x532   :  { %1483 = vmatprep.subr.mxu1 %v1181_v20 }
 0x533   :  { %v926_v25 = vrot.slane %v925_v22, 2  ;;  %v943_v2 = vadd.f32 %v942_v24, %v941_v21  ;;  %1491 = vmatpush3.msra.mxu1 %v1181_v20 }
 0x534   :  { %1484 = vmatprep.subr.mxu1 %v1180_v9 }
 0x535   :  { %v927_v4 = vadd.f32 %v926_v25, %v925_v22  ;;  %v944_v11 = vrot.slane %v943_v2, 2  ;;  %1492 = vmatpush3.msra.mxu1 %v1180_v9 }
 0x537   :  { %v928_v26 = vrot.slane %v927_v4, 1  ;;  %v945_v28 = vadd.f32 %v944_v11, %v943_v2 }
 0x539   :  { %v929_v29 = vadd.f32 %v928_v26, %v927_v4  ;;  %v946_v30 = vrot.slane %v945_v28, 1 }
 0x53b   :  { %v930_v31 = vmul.f32 0.03125, %v929_v29  ;;  %v947_v23 = vadd.f32 %v946_v30, %v945_v28  ;;  %v1179_v28 = vld [vmem:[%s2104_s5 + $0x18] sm:$0xff] }
 0x53c   :  { %1485 = vmatprep.subr.mxu1 %v1179_v28 }
 0x53d   :  { %v948_v32 = vmul.f32 0.03125, %v947_v23  ;;  %v949_v33 = vmul.f32 %v930_v31, %v930_v31  ;;  %1493 = vmatpush3.msra.mxu1 %v1179_v28  ;;  %v1178_v23 = vld [vmem:[%s2104_s5 + $0x10] sm:$0xff] }
 0x53e   :  { %1486 = vmatprep.subr.mxu1 %v1178_v23 }
 0x53f   :  { %v950_v34 = vsub.f32 %v948_v32, %v949_v33  ;;  %v1177_v32 = vld [vmem:[%s2104_s5 + $0x8] sm:$0xff]  ;;  %1494 = vmatpush3.msra.mxu1 %v1178_v23  ;;  %v1176_v33 = vld [vmem:[%s2104_s5] sm:$0xff] }
 0x540   :  { %1487 = vmatprep.subr.mxu1 %v1177_v32 }
 0x541   :  { %v951_v35 = vadd.f32 1e-05, %v950_v34  ;;  %1495 = vmatpush3.msra.mxu1 %v1177_v32 }
 0x542   :  { %1488 = vmatprep.subr.mxu1 %v1176_v33 }
 0x543   :  { %1553 = vrsqrt.f32 %v951_v35  ;;  %1496 = vmatpush3.msra.mxu1 %v1176_v33 }
 0x550   :  { %v1554_v37 = vpop.eup %1553 }
 0x551   :  { %v953_v38 = vmul.f32 %v1554_v37, %v915_v36 }
 0x553   :  { %v954_v40 = vmul.f32 %v953_v38, %v930_v31  ;;  %v959_v41 = vrot.slane %v953_v38, %v1696_v60 }
 0x555   :  { %v955_v42 = vsub.f32 %v916_v39, %v954_v40  ;;  %v963_v43 = vmul.f32 %v959_v41, %v911_v18  ;;  %v962_v45 = vmul.f32 %v959_v41, %v908_v57  ;;  %v960_v46 = vmul.f32 %v959_v41, %v900_v50 }
 0x556   :  { %v961_v47 = vmul.f32 %v959_v41, %v903_v52 }
 0x557   :  { %v967_v44 = vrot.slane %v955_v42, %v1696_v60 }
 0x559   :  { %v971_v48 = vadd.f32 %v967_v44, %v963_v43  ;;  %v970_v49 = vadd.f32 %v967_v44, %v962_v45  ;;  %v968_v51 = vadd.f32 %v967_v44, %v960_v46  ;;  %v969_v53 = vadd.f32 %v967_v44, %v961_v47 }
 0x55b   :  { %v975_v54 = vmax.f32 %v971_v48, 0.0  ;;  %v974_v55 = vmax.f32 %v970_v49, 0.0  ;;  %v972_v56 = vmax.f32 %v968_v51, 0.0  ;;  %v973_v59 = vmax.f32 %v969_v53, 0.0 }
 0x55d   :  { %v1004_v61 = vrot.slane %v975_v54, 7  ;;  %v1016_v0 = vrot.slane %v975_v54, 1  ;;  %v1028_v1 = vpack.c.bf16 %v975_v54, %v974_v55  ;;  %v1015_v3 = vrot.slane %v974_v55, 1 }
 0x55e   :  { %v1027_v60 = vpack.c.bf16 %v973_v59, %v972_v56  ;;  %v1013_v57 = vrot.slane %v972_v56, 1  ;;  %v1014_v50 = vrot.slane %v973_v59, 1  ;;  %v1002_v52 = vrot.slane %v973_v59, 7 }
 0x55f   :  { %1035 = vrot.lane.b32.xlu1 %v1028_v1, %s1556_s13  ;;  %v1001_v5 = vrot.slane %v972_v56, 7  ;;  %v1017_v7 = vsel %vm241_vm4, %v1015_v3, %v1016_v0  ;;  %v1003_v10 = vrot.slane %v974_v55, 7 }
 0x560   :  { %1033 = vrot.lane.b32.xlu0 %v1027_v60, %s1556_s13  ;;  %v1018_v18 = vsel %vm241_vm4, %v1014_v50, %v1015_v3  ;;  %v1019_v12 = vsel %vm241_vm4, %v1013_v57, %v1014_v50  ;;  %v1020_v13 = vsel %vm241_vm4, %v1016_v0, %v1013_v57 }
 0x561   :  { %v1022_v14 = vsel %vm33_vm3, 0.0, %v1018_v18  ;;  %v1007_v15 = vsel %vm228_vm2, %v1001_v5, %v1002_v52  ;;  %v1008_v16 = vsel %vm228_vm2, %v1004_v61, %v1001_v5  ;;  %v1024_v17 = vsel %vm33_vm3, 0.0, %v1020_v13 }
 0x562   :  { %v1029_v21 = vpack.c.bf16 %v1022_v14, %v1019_v12  ;;  %v1009_v22 = vsel %vm30_vm5, 0.0, %v1008_v16  ;;  %v1030_v24 = vpack.c.bf16 %v1024_v17, %v1017_v7  ;;  %v1005_v25 = vsel %vm228_vm2, %v1003_v10, %v1004_v61 }
 0x563   :  { %v1025_v2 = vpack.c.bf16 %v1007_v15, %v1009_v22  ;;  %v1006_v4 = vsel %vm228_vm2, %v1002_v52, %v1003_v10 }
 0x564   :  { %1427 = vmatprep.mubr.msk.bf16.mxu0 %vm139_vm1, %v1029_v21  ;;  %v1011_v11 = vsel %vm30_vm5, 0.0, %v1006_v4 }
 0x565   :  { %v1026_v26 = vpack.c.bf16 %v1005_v25, %v1011_v11 }
 0x5d1   :  { %v1036_v58 = vpop.permute.xlu1 %1035 }
 0x5d2   :  { %v1034_v29 = vpop.permute.xlu0 %1033  ;;  %v1043_v31 = vsel %vm139_vm1, %v1026_v26, %v1036_v58 }
 0x5d3   :  { %v1039_v30 = vsel %vm139_vm1, %v1025_v2, %v1034_v29 }
 0x5d4   :  { %1156 = vmatmul.mubr.bf16.vlgmr.msra.gmra.mxu0 %v1039_v30 }
 0x5d5   :  { %1428 = vmatprep.mubr.msk.bf16.mxu0 %vm139_vm1, %v1030_v24  ;;  %1460 = vmatpush3.msra.mxu0 %v1183_v6 }
 0x5d6   :  { %1461 = vmatprep.subr.mxu0 %v1182_v19 }
 0x5d7   :  { %1462 = vmatpush3.msra.mxu0 %v1182_v19 }
 0x5d8   :  { %1463 = vmatprep.subr.mxu0 %v1181_v20 }
 0x5d9   :  { %1464 = vmatpush3.msra.mxu0 %v1181_v20 }
 0x5da   :  { %1465 = vmatprep.subr.mxu0 %v1180_v9 }
 0x5db   :  { %1466 = vmatpush3.msra.mxu0 %v1180_v9 }
 0x5dc   :  { %1164 = vmatmul.mubr.bf16.gmra.mxu0 %v1043_v31  ;;  %1467 = vmatprep.subr.mxu0 %v1179_v28 }
 0x5dd   :  { %1468 = vmatpush3.msra.mxu0 %v1179_v28 }
 0x5de   :  { %1469 = vmatprep.subr.mxu0 %v1178_v23 }
 0x5df   :  { %1470 = vmatpush3.msra.mxu0 %v1178_v23 }
 0x5e0   :  { %1471 = vmatprep.subr.mxu0 %v1177_v32 }
 0x5e1   :  { %1472 = vmatpush3.msra.mxu0 %v1177_v32 }
 0x5e2   :  { %1473 = vmatprep.subr.mxu0 %v1176_v33 }
 0x5e3   :  { %1474 = vmatpush3.msra.mxu0 %v1176_v33 }
 0x694   :  { %v1157_v34 = vpop.f32.mrf.mxu0 }
 0x695   :  { %v1172_v35 = vadd.f32 %v1157_v34, %v1886_v62  ;;  %v1429_v62 = vld [vmem:[%s2105_s6] ss:$0 sm:$0xff] }
 0x696   :  { %v1159_v36 = vpop.f32.mrf.mxu0 }
 0x697   :  { %1475 = vmatprep.mubr.msk.f32.mxu0 %vm139_vm1, %v1172_v35 }
 0x698   :  { %v1160_v37 = vpop.f32.mrf.mxu0 }
 0x699   :  { %v1173_v38 = vadd.f32 %v1160_v37, %v1889_v63 }
 0x69a   :  { %v1162_v39 = vpop.f32.mrf.mxu0 }
 0x69b   :  { %1476 = vmatmul.mubr.msk.f32.vlgmr.msra.gmra.mxu0 %vm139_vm1, %v1173_v38 }
 0x69c   :  { %v1165_v40 = vpop.f32.mrf.mxu0 }
 0x69d   :  { %v1174_v41 = vadd.f32 %v1165_v40, %v1898_v8 }
 0x69e   :  { %v1167_v42 = vpop.f32.mrf.mxu0 }
 0x69f   :  { %1478 = vmatprep.mubr.msk.f32.mxu1 %vm139_vm1, %v1174_v41 }
 0x6a0   :  { %v1168_v43 = vpop.f32.mrf.mxu0 }
 0x6a1   :  { %v1175_v44 = vadd.f32 %v1168_v43, %v1910_v27 }
 0x6a2   :  { %v1170_v45 = vpop.f32.mrf.mxu0 }
 0x6a3   :  { %1479 = vmatmul.mubr.msk.f32.vlgmr.msra.gmra.mxu1 %vm139_vm1, %v1175_v44 }
 0x75b   :  { %v1477_v63 = vpop.f32.mrf.mxu0 }
 0x75c   :  { %v1275_v46 = vadd.f32 %v1477_v63, %v1429_v62 }
 0x75d   :  { %v1269_v47 = vpop.f32.mrf.mxu0 }
 0x75e   :  { %1290 = vst.msk [vmem:[%s2106_s7 + $0x8] sm:$0xff] %vm1288_vm6, %v1275_v46  ;;  %v1270_v8 = vadd.f32 %v1429_v62, %v1269_v47 }
 0x760   :  { %1289 = vst.msk [vmem:[%s2106_s7] sm:$0xff] %vm1288_vm6, %v1270_v8 }
 0x763   :  { %v1480_v27 = vpop.f32.mrf.mxu1 }
 0x764   :  { %v1285_v48 = vadd.f32 %v1480_v27, %v1429_v62 }
 0x765   :  { %v1279_v49 = vpop.f32.mrf.mxu1 }
 0x766   :  { %1292 = vst.msk [vmem:[%s2106_s7 + $0x18] sm:$0xff] %vm1288_vm6, %v1285_v48  ;;  %v1280_v51 = vadd.f32 %v1429_v62, %v1279_v49 }
 0x768   :  { %1291 = vst.msk [vmem:[%s2106_s7 + $0x10] sm:$0xff] %vm1288_vm6, %v1280_v51 }

</bundles_post_ra>
